<compile_context>
chip_gen: v7x
topology: tpu7x:2x2x1
jax: 0.10.0
libtpu: 0.0.40
codegen_flags: <defaults>
</compile_context>

<pallas_src>
import jax
import jax.numpy as jnp
from jax.experimental import pallas as pl
from jax.experimental.pallas import tpu as pltpu

IN_DIM = 132
HID = 128
OUT_DIM = 7
OUT_PAD = 128          # lane-dense output slab; wrapper slices back to 7
DEFAULT_TILE_B = 1024  # batch rows per grid step (multiple of 8)


def _round_up(n, m):
    return ((n + m - 1) // m) * m


def qnet_kernel(x_ref,
                w1_ref, b1_ref,
                w2_ref, b2_ref,
                w3_ref, b3_ref,
                w4_ref, b4_ref,
                w5_ref, b5_ref,
                o_ref):
    # x tile: (TILE_B, 132) f32 streamed per grid step.  Weights are bf16 and
    # VMEM-resident across the whole grid.  Each matmul feeds the MXU with
    # bf16 operands and accumulates in f32; bias add + ReLU stay f32.
    def layer(h, w_ref, b_ref, relu=True):
        acc = jnp.dot(h, w_ref[...], preferred_element_type=jnp.float32)
        acc = acc + b_ref[...]
        if relu:
            acc = jnp.maximum(acc, 0.0)
        return acc

    h = x_ref[...].astype(jnp.bfloat16)
    h = layer(h, w1_ref, b1_ref).astype(jnp.bfloat16)
    h = layer(h, w2_ref, b2_ref).astype(jnp.bfloat16)
    h = layer(h, w3_ref, b3_ref).astype(jnp.bfloat16)
    h = layer(h, w4_ref, b4_ref).astype(jnp.bfloat16)
    o_ref[...] = layer(h, w5_ref, b5_ref, relu=False)   # (TILE_B, 128) f32


def _prep_params(params):
    """Cast weights to bf16 and zero-pad the last layer to OUT_PAD lanes."""
    flat = []
    n = len(params)
    for i, (w, b) in enumerate(params):
        w = w.astype(jnp.bfloat16)
        b = b.astype(jnp.float32).reshape(1, -1)
        if i == n - 1:
            w = jnp.pad(w, ((0, 0), (0, OUT_PAD - w.shape[1])))
            b = jnp.pad(b, ((0, 0), (0, OUT_PAD - b.shape[1])))
        flat.append(w)
        flat.append(b)
    return flat


def qnet_forward(x, params, *, tile_b=DEFAULT_TILE_B):
    """x: (B, 132) float32.  params: list of (W_t, b) with W_t (in, out)."""
    x = x.astype(jnp.float32)
    B = x.shape[0]

    # Batch tile: multiple of 8 (f32 sublanes), capped by tile_b; pad B so it
    # divides evenly.  At TILE_B<=4096 the double-buffered x tile + 128-wide
    # out tile + ~270 KB of resident weights fit comfortably in the default
    # scoped VMEM on v5e/v6e/v7x.
    tile = max(8, min(_round_up(tile_b, 8), _round_up(B, 8)))
    B_pad = _round_up(B, tile)
    if B_pad != B:
        x = jnp.pad(x, ((0, B_pad - B), (0, 0)))
    grid = (B_pad // tile,)

    flat = _prep_params(params)

    # x / out stream over the batch grid; weights & biases use a constant
    # index_map so they are fetched once and stay VMEM-resident.
    x_spec = pl.BlockSpec((tile, IN_DIM), lambda i: (i, 0))
    const_specs = [pl.BlockSpec(a.shape, lambda i: (0, 0)) for a in flat]
    out_spec = pl.BlockSpec((tile, OUT_PAD), lambda i: (i, 0))

    flops = 2 * B_pad * (IN_DIM * HID + 3 * HID * HID + HID * OUT_PAD)
    bytes_accessed = int(
        x.size * 4 + B_pad * OUT_PAD * 4
        + sum(int(a.size) * a.dtype.itemsize for a in flat))

    out = pl.pallas_call(
        qnet_kernel,
        out_shape=jax.ShapeDtypeStruct((B_pad, OUT_PAD), jnp.float32),
        grid=grid,
        in_specs=[x_spec] + const_specs,
        out_specs=out_spec,
        compiler_params=pltpu.CompilerParams(
            dimension_semantics=("parallel",)),
        cost_estimate=pl.CostEstimate(
            flops=flops, transcendentals=0, bytes_accessed=bytes_accessed),
    )(x, *flat)

    return out[:B, :OUT_DIM]


def init_params(key):
    """Deterministic init mimicking nn.Linear default (uniform +-1/sqrt(fan_in)).
    Weights are stored pre-transposed: (fan_in, fan_out)."""
    dims = [(IN_DIM, HID), (HID, HID), (HID, HID), (HID, HID), (HID, OUT_DIM)]
    params = []
    for (fin, fout) in dims:
        key, kw, kb = jax.random.split(key, 3)
        bound = 1.0 / jnp.sqrt(float(fin))
        w = jax.random.uniform(kw, (fin, fout), jnp.float32, -bound, bound)
        b = jax.random.uniform(kb, (1, fout), jnp.float32, -bound, bound)
        params.append((w, b))
    return params


def qnet_reference_bf16(x, params):
    """Pure-JAX reference using the same math as the kernel
    (bf16 matmul operands, f32 accumulation, f32 bias/ReLU)."""
    h = x.astype(jnp.float32)
    for i, (w, b) in enumerate(params):
        h = jnp.dot(h.astype(jnp.bfloat16), w.astype(jnp.bfloat16),
                    preferred_element_type=jnp.float32) + b.reshape(1, -1)
        if i < len(params) - 1:
            h = jnp.maximum(h, 0.0)
    return h


if __name__ == "__main__":
    key = jax.random.PRNGKey(0)
    key, kx = jax.random.split(key)
    B = 64  # matches the DQN training batch size
    x = jax.random.normal(kx, (B, IN_DIM), jnp.float32)

    params = init_params(key)

    # Small tile so the batch grid / pipelined path is actually exercised.
    out = qnet_forward(x, params, tile_b=16)
    out = jax.block_until_ready(out)

    ref = qnet_reference_bf16(x, params)
    assert out.shape == (B, OUT_DIM), out.shape
    assert jnp.allclose(out, ref, atol=1e-2, rtol=1e-2), \
        float(jnp.max(jnp.abs(out - ref)))

    print("KERNEL_OK")
</pallas_src>

<mosaic_0001>
module attributes {stable_mosaic.version = 11 : i64} {
  func.func @qnet_kernel(%arg0: i32, %arg1: memref<16x132xf32, #tpu.memory_space<vmem>>, %arg2: memref<132x128xbf16, #tpu.memory_space<vmem>>, %arg3: memref<1x128xf32, #tpu.memory_space<vmem>>, %arg4: memref<128x128xbf16, #tpu.memory_space<vmem>>, %arg5: memref<1x128xf32, #tpu.memory_space<vmem>>, %arg6: memref<128x128xbf16, #tpu.memory_space<vmem>>, %arg7: memref<1x128xf32, #tpu.memory_space<vmem>>, %arg8: memref<128x128xbf16, #tpu.memory_space<vmem>>, %arg9: memref<1x128xf32, #tpu.memory_space<vmem>>, %arg10: memref<128x128xbf16, #tpu.memory_space<vmem>>, %arg11: memref<1x128xf32, #tpu.memory_space<vmem>>, %arg12: memref<16x128xf32, #tpu.memory_space<vmem>>) attributes {dimension_semantics = [#tpu.dimension_semantics<parallel>], iteration_bounds = array<i64: 4>, scalar_prefetch = 0 : i64, scratch_operands = 0 : i64, tpu.core_type = #tpu.core_type<tc>, window_params = [{transform_indices = @transform_0, window_bounds = array<i64: 16, 132>}, {pipeline_mode = #tpu.pipeline_mode<synchronous>, transform_indices = @transform_1, window_bounds = array<i64: 132, 128>}, {pipeline_mode = #tpu.pipeline_mode<synchronous>, transform_indices = @transform_2, window_bounds = array<i64: 1, 128>}, {pipeline_mode = #tpu.pipeline_mode<synchronous>, transform_indices = @transform_3, window_bounds = array<i64: 128, 128>}, {pipeline_mode = #tpu.pipeline_mode<synchronous>, transform_indices = @transform_4, window_bounds = array<i64: 1, 128>}, {pipeline_mode = #tpu.pipeline_mode<synchronous>, transform_indices = @transform_5, window_bounds = array<i64: 128, 128>}, {pipeline_mode = #tpu.pipeline_mode<synchronous>, transform_indices = @transform_6, window_bounds = array<i64: 1, 128>}, {pipeline_mode = #tpu.pipeline_mode<synchronous>, transform_indices = @transform_7, window_bounds = array<i64: 128, 128>}, {pipeline_mode = #tpu.pipeline_mode<synchronous>, transform_indices = @transform_8, window_bounds = array<i64: 1, 128>}, {pipeline_mode = #tpu.pipeline_mode<synchronous>, transform_indices = @transform_9, window_bounds = array<i64: 128, 128>}, {pipeline_mode = #tpu.pipeline_mode<synchronous>, transform_indices = @transform_10, window_bounds = array<i64: 1, 128>}, {transform_indices = @transform_11, window_bounds = array<i64: 16, 128>}]} {
    %c0 = arith.constant 0 : index
    %c0_0 = arith.constant 0 : index
    %0 = vector.load %arg1[%c0, %c0_0] : memref<16x132xf32, #tpu.memory_space<vmem>>, vector<16x132xf32>
    %1 = arith.truncf %0 : vector<16x132xf32> to vector<16x132xbf16>
    %c0_1 = arith.constant 0 : index
    %c0_2 = arith.constant 0 : index
    %2 = vector.load %arg2[%c0_1, %c0_2] : memref<132x128xbf16, #tpu.memory_space<vmem>>, vector<132x128xbf16>
    %cst = arith.constant dense<0.000000e+00> : vector<16x128xf32>
    %3 = tpu.matmul %1, %2, %cst {dimension_numbers = #tpu.dot_dimension_numbers<[1], [0], [0], [1], [0, 0, 1, 1], [], []>} : vector<16x132xbf16>, vector<132x128xbf16>, vector<16x128xf32> -> vector<16x128xf32>
    %c0_3 = arith.constant 0 : index
    %c0_4 = arith.constant 0 : index
    %4 = vector.load %arg3[%c0_3, %c0_4] : memref<1x128xf32, #tpu.memory_space<vmem>>, vector<1x128xf32>
    %5 = vector.broadcast %4 : vector<1x128xf32> to vector<16x128xf32>
    %6 = arith.addf %3, %5 : vector<16x128xf32>
    %cst_5 = arith.constant 0.000000e+00 : f32
    %7 = vector.broadcast %cst_5 : f32 to vector<16x128xf32>
    %8 = arith.maximumf %6, %7 : vector<16x128xf32>
    %9 = arith.truncf %8 : vector<16x128xf32> to vector<16x128xbf16>
    %c0_6 = arith.constant 0 : index
    %c0_7 = arith.constant 0 : index
    %10 = vector.load %arg4[%c0_6, %c0_7] : memref<128x128xbf16, #tpu.memory_space<vmem>>, vector<128x128xbf16>
    %cst_8 = arith.constant dense<0.000000e+00> : vector<16x128xf32>
    %11 = tpu.matmul %9, %10, %cst_8 {dimension_numbers = #tpu.dot_dimension_numbers<[1], [0], [0], [1], [0, 0, 1, 1], [], []>} : vector<16x128xbf16>, vector<128x128xbf16>, vector<16x128xf32> -> vector<16x128xf32>
    %c0_9 = arith.constant 0 : index
    %c0_10 = arith.constant 0 : index
    %12 = vector.load %arg5[%c0_9, %c0_10] : memref<1x128xf32, #tpu.memory_space<vmem>>, vector<1x128xf32>
    %13 = vector.broadcast %12 : vector<1x128xf32> to vector<16x128xf32>
    %14 = arith.addf %11, %13 : vector<16x128xf32>
    %cst_11 = arith.constant 0.000000e+00 : f32
    %15 = vector.broadcast %cst_11 : f32 to vector<16x128xf32>
    %16 = arith.maximumf %14, %15 : vector<16x128xf32>
    %17 = arith.truncf %16 : vector<16x128xf32> to vector<16x128xbf16>
    %c0_12 = arith.constant 0 : index
    %c0_13 = arith.constant 0 : index
    %18 = vector.load %arg6[%c0_12, %c0_13] : memref<128x128xbf16, #tpu.memory_space<vmem>>, vector<128x128xbf16>
    %cst_14 = arith.constant dense<0.000000e+00> : vector<16x128xf32>
    %19 = tpu.matmul %17, %18, %cst_14 {dimension_numbers = #tpu.dot_dimension_numbers<[1], [0], [0], [1], [0, 0, 1, 1], [], []>} : vector<16x128xbf16>, vector<128x128xbf16>, vector<16x128xf32> -> vector<16x128xf32>
    %c0_15 = arith.constant 0 : index
    %c0_16 = arith.constant 0 : index
    %20 = vector.load %arg7[%c0_15, %c0_16] : memref<1x128xf32, #tpu.memory_space<vmem>>, vector<1x128xf32>
    %21 = vector.broadcast %20 : vector<1x128xf32> to vector<16x128xf32>
    %22 = arith.addf %19, %21 : vector<16x128xf32>
    %cst_17 = arith.constant 0.000000e+00 : f32
    %23 = vector.broadcast %cst_17 : f32 to vector<16x128xf32>
    %24 = arith.maximumf %22, %23 : vector<16x128xf32>
    %25 = arith.truncf %24 : vector<16x128xf32> to vector<16x128xbf16>
    %c0_18 = arith.constant 0 : index
    %c0_19 = arith.constant 0 : index
    %26 = vector.load %arg8[%c0_18, %c0_19] : memref<128x128xbf16, #tpu.memory_space<vmem>>, vector<128x128xbf16>
    %cst_20 = arith.constant dense<0.000000e+00> : vector<16x128xf32>
    %27 = tpu.matmul %25, %26, %cst_20 {dimension_numbers = #tpu.dot_dimension_numbers<[1], [0], [0], [1], [0, 0, 1, 1], [], []>} : vector<16x128xbf16>, vector<128x128xbf16>, vector<16x128xf32> -> vector<16x128xf32>
    %c0_21 = arith.constant 0 : index
    %c0_22 = arith.constant 0 : index
    %28 = vector.load %arg9[%c0_21, %c0_22] : memref<1x128xf32, #tpu.memory_space<vmem>>, vector<1x128xf32>
    %29 = vector.broadcast %28 : vector<1x128xf32> to vector<16x128xf32>
    %30 = arith.addf %27, %29 : vector<16x128xf32>
    %cst_23 = arith.constant 0.000000e+00 : f32
    %31 = vector.broadcast %cst_23 : f32 to vector<16x128xf32>
    %32 = arith.maximumf %30, %31 : vector<16x128xf32>
    %33 = arith.truncf %32 : vector<16x128xf32> to vector<16x128xbf16>
    %c0_24 = arith.constant 0 : index
    %c0_25 = arith.constant 0 : index
    %34 = vector.load %arg10[%c0_24, %c0_25] : memref<128x128xbf16, #tpu.memory_space<vmem>>, vector<128x128xbf16>
    %cst_26 = arith.constant dense<0.000000e+00> : vector<16x128xf32>
    %35 = tpu.matmul %33, %34, %cst_26 {dimension_numbers = #tpu.dot_dimension_numbers<[1], [0], [0], [1], [0, 0, 1, 1], [], []>} : vector<16x128xbf16>, vector<128x128xbf16>, vector<16x128xf32> -> vector<16x128xf32>
    %c0_27 = arith.constant 0 : index
    %c0_28 = arith.constant 0 : index
    %36 = vector.load %arg11[%c0_27, %c0_28] : memref<1x128xf32, #tpu.memory_space<vmem>>, vector<1x128xf32>
    %37 = vector.broadcast %36 : vector<1x128xf32> to vector<16x128xf32>
    %38 = arith.addf %35, %37 : vector<16x128xf32>
    %c0_29 = arith.constant 0 : index
    %c0_30 = arith.constant 0 : index
    %39 = vector.load %arg12[%c0_29, %c0_30] : memref<16x128xf32, #tpu.memory_space<vmem>>, vector<16x128xf32>
    tpu.vector_store %arg12[%c0_29, %c0_30], %38 {strides = array<i32>} : memref<16x128xf32, #tpu.memory_space<vmem>>, vector<16x128xf32>,
    return
  }
  func.func @transform_0(%arg0: i32) -> (i32, i32) {
    %c0_i32 = arith.constant 0 : i32
    %c0_i32_0 = arith.constant 0 : i32
    return %arg0, %c0_i32 : i32, i32
  }
  func.func @transform_1(%arg0: i32) -> (i32, i32) {
    %c0_i32 = arith.constant 0 : i32
    %c0_i32_0 = arith.constant 0 : i32
    %c0_i32_1 = arith.constant 0 : i32
    return %c0_i32, %c0_i32_0 : i32, i32
  }
  func.func @transform_2(%arg0: i32) -> (i32, i32) {
    %c0_i32 = arith.constant 0 : i32
    %c0_i32_0 = arith.constant 0 : i32
    %c0_i32_1 = arith.constant 0 : i32
    return %c0_i32, %c0_i32_0 : i32, i32
  }
  func.func @transform_3(%arg0: i32) -> (i32, i32) {
    %c0_i32 = arith.constant 0 : i32
    %c0_i32_0 = arith.constant 0 : i32
    %c0_i32_1 = arith.constant 0 : i32
    return %c0_i32, %c0_i32_0 : i32, i32
  }
  func.func @transform_4(%arg0: i32) -> (i32, i32) {
    %c0_i32 = arith.constant 0 : i32
    %c0_i32_0 = arith.constant 0 : i32
    %c0_i32_1 = arith.constant 0 : i32
    return %c0_i32, %c0_i32_0 : i32, i32
  }
  func.func @transform_5(%arg0: i32) -> (i32, i32) {
    %c0_i32 = arith.constant 0 : i32
    %c0_i32_0 = arith.constant 0 : i32
    %c0_i32_1 = arith.constant 0 : i32
    return %c0_i32, %c0_i32_0 : i32, i32
  }
  func.func @transform_6(%arg0: i32) -> (i32, i32) {
    %c0_i32 = arith.constant 0 : i32
    %c0_i32_0 = arith.constant 0 : i32
    %c0_i32_1 = arith.constant 0 : i32
    return %c0_i32, %c0_i32_0 : i32, i32
  }
  func.func @transform_7(%arg0: i32) -> (i32, i32) {
    %c0_i32 = arith.constant 0 : i32
    %c0_i32_0 = arith.constant 0 : i32
    %c0_i32_1 = arith.constant 0 : i32
    return %c0_i32, %c0_i32_0 : i32, i32
  }
  func.func @transform_8(%arg0: i32) -> (i32, i32) {
    %c0_i32 = arith.constant 0 : i32
    %c0_i32_0 = arith.constant 0 : i32
    %c0_i32_1 = arith.constant 0 : i32
    return %c0_i32, %c0_i32_0 : i32, i32
  }
  func.func @transform_9(%arg0: i32) -> (i32, i32) {
    %c0_i32 = arith.constant 0 : i32
    %c0_i32_0 = arith.constant 0 : i32
    %c0_i32_1 = arith.constant 0 : i32
    return %c0_i32, %c0_i32_0 : i32, i32
  }
  func.func @transform_10(%arg0: i32) -> (i32, i32) {
    %c0_i32 = arith.constant 0 : i32
    %c0_i32_0 = arith.constant 0 : i32
    %c0_i32_1 = arith.constant 0 : i32
    return %c0_i32, %c0_i32_0 : i32, i32
  }
  func.func @transform_11(%arg0: i32) -> (i32, i32) {
    %c0_i32 = arith.constant 0 : i32
    %c0_i32_0 = arith.constant 0 : i32
    return %arg0, %c0_i32 : i32, i32
  }
}

</mosaic_0001>

<bundles_post_ra>
// kernel: tpu_custom_call.1
= control target key start
LH: loop header
LB: loop body
LE: loop exit
PB: predicated region body
PF: predicated region fallthrough
CT: control target
= control target key end

     0   :  { %s2249_s0 = inlined_call_operand.hbm [shape: f32[64,132], index: 0, kind: input, shape index: {}]   ;;  %s2250_s1 = inlined_call_operand.hbm [shape: bf16[132,128], index: 1, kind: input, shape index: {}]   ;;  %s2251_s2 = inlined_call_operand.vmem [shape: f32[1,128], index: 2, kind: input, shape index: {}]   ;;  %s2252_s3 = inlined_call_operand.hbm [shape: bf16[128,128], index: 3, kind: input, shape index: {}]   ;;  %s2253_s4 = inlined_call_operand.vmem [shape: f32[1,128], index: 4, kind: input, shape index: {}]   ;;  %s2254_s5 = inlined_call_operand.hbm [shape: bf16[128,128], index: 5, kind: input, shape index: {}]   ;;  %s2255_s6 = inlined_call_operand.vmem [shape: f32[1,128], index: 6, kind: input, shape index: {}]   ;;  %s2256_s7 = inlined_call_operand.hbm [shape: bf16[128,128], index: 7, kind: input, shape index: {}]   ;;  %s2257_s8 = inlined_call_operand.vmem [shape: f32[1,128], index: 8, kind: input, shape index: {}]   ;;  %s2258_s9 = inlined_call_operand.hbm [shape: bf16[128,128], index: 9, kind: input, shape index: {}]   ;;  %s2259_s10 = inlined_call_operand.vmem [shape: f32[1,128], index: 10, kind: input, shape index: {}]   ;;  %s2260_s11 = inlined_call_operand.hbm [shape: f32[64,128], index: 11, kind: output, shape index: {}]  }
   0x1   :  { %2265 = sst [smem:[#allocation19_spill]] %s2250_s1 }
   0x2   :  { %2266 = sst [smem:[#allocation20_spill]] %s2257_s8 }
   0x3   :  { %2267 = sst [smem:[#allocation21_spill]] %s2259_s10 }
   0x4   :  { %2268 = sst [smem:[#allocation22_spill]] %s2260_s11 }
   0x5   :  { %16 = vsyncpa [#allocation3], 0 }
   0x6   :  { %18 = vsyncpa [#allocation3 + $0x1], 0 }
   0x7   :  { %19 = vsyncpa [#allocation6], 0 }
   0x8   :  { %20 = vsyncpa [#allocation9], 0 }
   0x9   :  { %21 = vsyncpa [#allocation12], 0 }
   0xa   :  { %22 = vsyncpa [#allocation4], 0 }
   0xb   :  { %24 = vsyncpa [#allocation4 + $0x1], 0  ;;  %s1873_s17 = smov 0   ;;  %s1875_s18 = smov 0  }
   0xc   :  { %s1877_s19 = smov 0   ;;  %s1879_s20 = smov 0  }
   0xd LB: > { %s1797_s21 = smov [#allocation5]   ;;  %s1894_s23 = sadd.s32 4294967295, %s1795_s20   ;;  %s1795_s20 = sphi %s1879_s20, %s2293_s20   ;;  %s1791_s19 = sphi %s1877_s19, %s2292_s19   ;;  %s1787_s18 = sphi %s1875_s18, %s2291_s18   ;;  %s1783_s17 = sphi %s1873_s17, %s2290_s17  }
   0xe   : > { %s309_s22 = sshll.u32 %s1797_s21, 4  ;;  %p1210_p0 = scmp.ge.s32.totalorder %s1795_s20, 1  ;;  %s1899_s22 = int_to_ptr.vmem [resolvable:$true] %s309_s22 }
   0xf   : > { %p2262_p1 = scmp.eq.s32.totalorder %s1894_s23, 0  ;;  %p297_p2 = scmp.lt.s32.totalorder %s1795_s20, 5 }
  0x10   : > { %s1798_s25 = smov [#allocation8]   ;;  %s1799_s28 = smov [#allocation7]  }
  0x11   : > { %p1901_p3 = pnand %p1210_p0, %p297_p2  ;;  %s341_s26 = sshll.u32 %s1798_s25, 4  ;;  %s1913_s26 = int_to_ptr.vmem [resolvable:$true] %s341_s26 }
  0x12   : > { %s325_s29 = sshll.u32 %s1799_s28, 4  ;;  %s2271_s1 = sld [smem:[#allocation19_spill]]  ;;  %s1915_s29 = int_to_ptr.vmem [resolvable:$true] %s325_s29 }
  0x13   : > { %s2269_s24 = scalar_select %p1901_p3, 1, 0 }
  0x14   : > { %p1424_p4 = pneg %p1901_p3 }
  0x16   : > { %p1909_p5 = pnand %p1424_p4, %p2262_p1 }
  0x18   : > { %s1547_s13 = scalar_lea.hbm %s2271_s1, 1088  ;;  %p1925_p7 = pneg %p1909_p5 }
  0x19   : > { %p1548_p6 = scmp.ne.s32.totalorder %s2271_s1, %s1547_s13  ;;  %p1554_p10 = scmp.lt.u32.totalorder %s1547_s13, %s2271_s1 }
  0x1b   : > { %p1550_p8 = pnand %p1925_p7, %p1548_p6 }
  0x1d   : > { %p1551_p9 = pneg %p1550_p8 }
  0x1f   : > { %p1556_p11 = pnand %p1554_p10, %p1551_p9 }
  0x21   : > { %1559 = shalt.err (!%p1556_p11)
}
  0x22   : > { %s1560_s28 = scalar_lea.vmem %s1899_s22, 1088  ;;  %p1568_p2 = scmp.lt.s32.totalorder %s1899_s22, %s1899_s22 }
  0x23   : > { %p1561_p12 = scmp.ne.s32.totalorder %s1899_s22, %s1560_s28  ;;  %p1569_p4 = scmp.lt.s32.totalorder %s1560_s28, %s1560_s28 }
  0x25   : > { %p1563_p13 = pnand %p1561_p12, %p1925_p7  ;;  %p1570_p6 = por %p1569_p4, %p1568_p2 }
  0x27   : > { %p1564_p0 = pneg %p1563_p13 }
  0x29   : > { %p1571_p8 = pnand %p1570_p6, %p1564_p0 }
  0x2b   : > { %1574 = shalt.err (!%p1571_p8)
}
  0x2c   : > { %s1800_s30 = smov 64   ;;  %s1801_s12 = smov 4  }
  0x2d   : > { %1427 = dma.hbm_to_vmem [thread:$0]  (!%p1909_p5), %s2271_s1, 1088, %s1899_s22, [#allocation6], %s1800_s30, %s1800_s30, %s1801_s12  }
  0x2e   : > { %s1575_s25 = scalar_lea.hbm %s2254_s5, 1024 }
  0x2f   : > { %p1576_p9 = scmp.ne.s32.totalorder %s2254_s5, %s1575_s25  ;;  %p1582_p12 = scmp.lt.u32.totalorder %s1575_s25, %s2254_s5 }
  0x31   : > { %p1578_p10 = pnand %p1576_p9, %p1925_p7 }
  0x33   : > { %p1579_p11 = pneg %p1578_p10 }
  0x35   : > { %p1584_p13 = pnand %p1582_p12, %p1579_p11 }
  0x37   : > { %1587 = shalt.err (!%p1584_p13)
}
  0x38   : > { %s1588_s22 = scalar_lea.vmem %s1913_s26, 1024  ;;  %p1596_p6 = scmp.lt.s32.totalorder %s1913_s26, %s1913_s26 }
  0x39   : > { %p1589_p0 = scmp.ne.s32.totalorder %s1913_s26, %s1588_s22  ;;  %p1597_p8 = scmp.lt.s32.totalorder %s1588_s22, %s1588_s22 }
  0x3b   : > { %p1591_p2 = pnand %p1589_p0, %p1925_p7  ;;  %p1598_p9 = por %p1597_p8, %p1596_p6 }
  0x3d   : > { %p1592_p4 = pneg %p1591_p2 }
  0x3f   : > { %p1599_p10 = pnand %p1598_p9, %p1592_p4 }
  0x41   : > { %1602 = shalt.err (!%p1599_p10)
}
  0x42   : > { %1433 = dma.hbm_to_vmem [thread:$0]  (!%p1909_p5), %s2254_s5, 1024, %s1913_s26, [#allocation9], %s1800_s30, %s1800_s30, %s1801_s12  }
  0x43   : > { %s1603_s14 = scalar_lea.hbm %s2252_s3, 1024 }
  0x44   : > { %p1604_p11 = scmp.ne.s32.totalorder %s2252_s3, %s1603_s14  ;;  %p1610_p0 = scmp.lt.u32.totalorder %s1603_s14, %s2252_s3 }
  0x46   : > { %p1606_p12 = pnand %p1604_p11, %p1925_p7 }
  0x48   : > { %p1607_p13 = pneg %p1606_p12 }
  0x4a   : > { %p1612_p2 = pnand %p1610_p0, %p1607_p13 }
  0x4c   : > { %1615 = shalt.err (!%p1612_p2)
}
  0x4d   : > { %s1616_s26 = scalar_lea.vmem %s1915_s29, 1024  ;;  %p1624_p9 = scmp.lt.s32.totalorder %s1915_s29, %s1915_s29 }
  0x4e   : > { %p1617_p4 = scmp.ne.s32.totalorder %s1915_s29, %s1616_s26  ;;  %p1625_p10 = scmp.lt.s32.totalorder %s1616_s26, %s1616_s26 }
  0x50   : > { %p1619_p6 = pnand %p1617_p4, %p1925_p7  ;;  %p1626_p11 = por %p1625_p10, %p1624_p9 }
  0x52   : > { %p1620_p8 = pneg %p1619_p6 }
  0x54   : > { %p1627_p12 = pnand %p1626_p11, %p1620_p8 }
  0x56   : > { %1630 = shalt.err (!%p1627_p12)
}
  0x57   : > { %1430 = dma.hbm_to_vmem [thread:$0]  (!%p1909_p5), %s2252_s3, 1024, %s1915_s29, [#allocation6], %s1800_s30, %s1800_s30, %s1801_s12  }
  0x58   : > { %s1802_s10 = smov [#allocation10]   ;;  %s1803_s13 = smov [#allocation11]  }
  0x59   : > { %s357_s11 = sshll.u32 %s1802_s10, 4  ;;  %s373_s14 = sshll.u32 %s1803_s13, 4  ;;  %s358_s11 = int_to_ptr.vmem [resolvable:$true] %s357_s11  ;;  %s374_s14 = int_to_ptr.vmem [resolvable:$true] %s373_s14 }
  0x5a   : > { %s1631_s25 = scalar_lea.hbm %s2256_s7, 1024 }
  0x5b   : > { %p1632_p13 = scmp.ne.s32.totalorder %s2256_s7, %s1631_s25  ;;  %p1638_p4 = scmp.lt.u32.totalorder %s1631_s25, %s2256_s7 }
  0x5d   : > { %p1634_p0 = pnand %p1632_p13, %p1925_p7 }
  0x5f   : > { %p1635_p2 = pneg %p1634_p0 }
  0x61   : > { %p1640_p6 = pnand %p1638_p4, %p1635_p2 }
  0x63   : > { %1643 = shalt.err (!%p1640_p6)
}
  0x64   : > { %s1644_s29 = scalar_lea.vmem %s358_s11, 1024  ;;  %p1652_p11 = scmp.lt.s32.totalorder %s358_s11, %s358_s11 }
  0x65   : > { %p1645_p8 = scmp.ne.s32.totalorder %s358_s11, %s1644_s29  ;;  %p1653_p12 = scmp.lt.s32.totalorder %s1644_s29, %s1644_s29 }
  0x67   : > { %p1647_p9 = pnand %p1645_p8, %p1925_p7  ;;  %p1654_p1 = por %p1653_p12, %p1652_p11 }
  0x69   : > { %p1648_p10 = pneg %p1647_p9 }
  0x6b   : > { %p1655_p3 = pnand %p1654_p1, %p1648_p10 }
  0x6d   : > { %1658 = shalt.err (!%p1655_p3)
}
  0x6e   : > { %1436 = dma.hbm_to_vmem [thread:$0]  (!%p1909_p5), %s2256_s7, 1024, %s358_s11, [#allocation9], %s1800_s30, %s1800_s30, %s1801_s12  }
  0x6f   : > { %s1659_s15 = scalar_lea.hbm %s2258_s9, 1024 }
  0x70   : > { %p1660_p1 = scmp.ne.s32.totalorder %s2258_s9, %s1659_s15  ;;  %p1666_p0 = scmp.lt.u32.totalorder %s1659_s15, %s2258_s9 }
  0x72   : > { %p1662_p3 = pnand %p1660_p1, %p1925_p7 }
  0x74   : > { %p1663_p13 = pneg %p1662_p3 }
  0x76   : > { %p1668_p2 = pnand %p1666_p0, %p1663_p13 }
  0x78   : > { %1671 = shalt.err (!%p1668_p2)
}
  0x79   : > { %s1672_s22 = scalar_lea.vmem %s374_s14, 1024  ;;  %p1680_p9 = scmp.lt.s32.totalorder %s374_s14, %s374_s14 }
  0x7a   : > { %p1673_p4 = scmp.ne.s32.totalorder %s374_s14, %s1672_s22  ;;  %p1681_p10 = scmp.lt.s32.totalorder %s1672_s22, %s1672_s22 }
  0x7c   : > { %p1675_p6 = pnand %p1673_p4, %p1925_p7  ;;  %p1682_p11 = por %p1681_p10, %p1680_p9 }
  0x7e   : > { %p1676_p8 = pneg %p1675_p6 }
  0x80   : > { %p1683_p12 = pnand %p1682_p11, %p1676_p8 }
  0x82   : > { %1686 = shalt.err (!%p1683_p12)
}
  0x83   : > { %1439 = dma.hbm_to_vmem [thread:$0]  (!%p1909_p5), %s2258_s9, 1024, %s374_s14, [#allocation12], %s1800_s30, %s1800_s30, %s1801_s12  }
  0x84   : > { %s1209_s27 = sadd.s32 4294967294, %s1795_s20   ;;  %s2045_s16 = sadd.s32 1, %s1795_s20  }
  0x85   : > { %s37_s1 = sadd.s32 1, %s1791_s19  ;;  %s34_s8 = ssub.s32 %s1795_s20, %s2045_s16 }
  0x86   : > { %p44_p7 = scmp.ne.s32.totalorder %s1791_s19, %s1787_s18  ;;  %p35_p1 = scmp.eq.s32.totalorder %s34_s8, 0 }
  0x87   : > { %p45_p3 = scmp.eq.s32.totalorder %s1795_s20, 0  ;;  %p50_p13 = scmp.ne.s32.totalorder %s1787_s18, %s1783_s17 }
  0x88   : > { %p284_p0 = scmp.eq.s32.totalorder %s1894_s23, 3  ;;  %p2273_p4 = scmp.eq.s32.totalorder %s1894_s23, 0 }
  0x89   : > { %s2057_s10 = scalar_select %p35_p1, %s1791_s19, %s37_s1  }
  0x8a   : > { %p46_p2 = por %p45_p3, %p44_p7  ;;  %p2061_p6 = por %p2273_p4, %p50_p13 }
  0x8b   : > { %p2065_p5 = por %p284_p0, %p44_p7  ;;  %p290_p8 = scmp.eq.s32.totalorder %s1209_s27, 3 }
  0x8c   : > { %p1453_p9 = scmp.lt.s32.totalorder %s1795_s20, 4  ;;  %s390_s12 = sand.u32 1, %s1791_s19  }
  0x8d   : > { %s2275_s30 = scalar_select %p2065_p5, 1, 0 }
  0x8e   : > { %p2071_p10 = por %p290_p8, %p50_p13  ;;  %s1217_s15 = sshll.u32 %s390_s12, 5 }
  0x8f   : > { %s1282_s21 = sshll.u32 %s1795_s20, 9  ;;  %s394_s22 = scalar_lea.vmem [#allocation2], %s1217_s15 }
  0x90   : > { %s2276_s14 = scalar_select %p2071_p10, 1, 0 }
  0x91   : > { %s2079_s26 = scalar_lea.hbm %s2249_s0, %s1282_s21  ;;  %s402_s11 = sshll.u32 %s394_s22, 4  ;;  %s2085_s11 = int_to_ptr.vmem [resolvable:$true] %s402_s11 }
  0x92   : > { %p2081_p11 = pnand %p1453_p9, %p46_p2  ;;  %s2087_s27 = scalar_lea.sflag [#allocation3], %s390_s12 }
  0x93   : > { %s1687_s1 = scalar_lea.hbm %s2079_s26, 512  ;;  %s1692_s21 = scalar_lea.hbm %s2249_s0, 2048 }
  0x94   : > { %p1688_p12 = scmp.ne.s32.totalorder %s2079_s26, %s1687_s1  ;;  %p1689_p7 = pneg %p2081_p11 }
  0x95   : > { %p1693_p13 = scmp.lt.u32.totalorder %s2079_s26, %s2249_s0  ;;  %p1694_p0 = scmp.lt.u32.totalorder %s1692_s21, %s1687_s1 }
  0x96   : > { %p1690_p1 = pnand %p1689_p7, %p1688_p12  ;;  %p1696_p4 = scmp.lt.u32.totalorder %s1687_s1, %s2079_s26 }
  0x97   : > { %p1695_p2 = por %p1694_p0, %p1693_p13 }
  0x98   : > { %p1691_p3 = pneg %p1690_p1 }
  0x99   : > { %p1697_p8 = por %p1696_p4, %p1695_p2 }
  0x9b   : > { %p1698_p9 = pnand %p1697_p8, %p1691_p3 }
  0x9d   : > { %1701 = shalt.err (!%p1698_p9)
}
  0x9e   : > { %s1702_s12 = scalar_lea.vmem %s2085_s11, 512  ;;  %s1804_s22 = smov [#allocation2]  }
  0x9f   : > { %p1703_p12 = scmp.ne.s32.totalorder %s2085_s11, %s1702_s12  ;;  %s1707_s8 = sshll.u32 %s1804_s22, 4  ;;  %s1708_s8 = int_to_ptr.vmem [resolvable:$false] %s1707_s8 }
  0xa0   : > { %s1709_s15 = scalar_lea.vmem %s1708_s8, 1024  ;;  %p1710_p5 = scmp.lt.s32.totalorder %s2085_s11, %s1708_s8 }
  0xa1   : > { %p1705_p1 = pnand %p1703_p12, %p1689_p7  ;;  %p1711_p13 = scmp.lt.s32.totalorder %s1709_s15, %s1702_s12 }
  0xa3   : > { %p1706_p10 = pneg %p1705_p1  ;;  %p1712_p0 = por %p1711_p13, %p1710_p5 }
  0xa5   : > { %p1713_p2 = pnand %p1712_p0, %p1706_p10 }
  0xa7   : > { %1716 = shalt.err (!%p1713_p2)
}
  0xa8   : > { %s1805_s1 = smov 256   ;;  %s1806_s21 = smov 16  }
  0xa9   : > { %1443 = dma.hbm_to_vmem [thread:$0]  (!%p2081_p11), %s2079_s26, 512, %s2085_s11, %s2087_s27, %s1805_s1, %s1805_s1, %s1806_s21  }
  0xaa   : > { %p2278_p7 = scmp.ne.s32.totalorder %s2269_s24, 0 }
  0xab   : > { %s2118_s25 = sand.u32 (!%p2278_p7), 1, %s1787_s18  }
  0xac   : > { %414 = sbr.rel (%p2278_p7) target bundleno = 1338 (0x53a), region = 64  ;;  %s1222_s28 = sshll.u32 (!%p2278_p7), %s2118_s25, 5 }
  0xad   : > { %s417_s12 = scalar_lea.sflag (!%p2278_p7), [#allocation3], %s2118_s25  ;;  %s2122_s22 = scalar_lea.vmem (!%p2278_p7), [#allocation2], %s1222_s28 }
  0xb3   : > { %1762 = dma.done.wait (%p2061_p6), %s417_s12, 512  }
  0xb4   : > { %1764 = vsyncadd (%p2061_p6), %s417_s12, 4294966784  ;;  %p2279_p5 = scmp.eq.s32.totalorder %s1894_s23, 0 }
  0xb6   : > { %1766 = dma.done.wait (%p2279_p5), [#allocation6], 2112   ;;  %p2280_p10 = pmov %p2279_p5 }
  0xb7   : > { %p2281_p11 = pmov %p2279_p5 }
  0xb8   : > { %1768 = vsyncadd (%p2280_p10), [#allocation6], 4294965184 }
  0xb9   : > { %1770 = dma.done.wait (%p2281_p11), [#allocation9], 2048   ;;  %p2282_p3 = pmov %p2279_p5 }
  0xbb   : > { %1772 = vsyncadd (%p2282_p3), [#allocation9], 4294965248  ;;  %p2283_p4 = pmov %p2282_p3 }
  0xbc   : > { %p2284_p8 = pmov %p2282_p3 }
  0xbd   : > { %1774 = dma.done.wait (%p2283_p4), [#allocation12], 1024  }
  0xbe   : > { %1776 = vsyncadd (%p2284_p8), [#allocation12], 4294966272  ;;  %v1807_v0 = vmov 0   ;;  %v1808_v1 = vmov 0.0   ;;  %v1506_v2 = vld [vmem:[#allocation5] sm:$0xff]   ;;  %v1507_v3 = vld [vmem:[#allocation5 + $0x8] sm:$0xff]  }
  0xbf   : > { %571 = vmatprep.subr.bf16.mxu0 %v1807_v0  ;;  %1320 = vmatprep.subr.bf16.mxu1 %v1808_v1  ;;  %v1508_v4 = vld [vmem:[#allocation5 + $0x10] sm:$0xff]   ;;  %v483_v5 = vld [vmem:[%s2122_s22 + $0x8] sm:$0xff]  ;;  %v1509_v6 = vld [vmem:[#allocation5 + $0x18] sm:$0xff]   ;;  %vm563_vm0 = vcmask 31744   ;;  %vm567_vm1 = vcmask 1041408   ;;  %vm1809_vm2 = vmmov 0  }
  0xc0   : > { %572 = vmatpush1.bf16.msra.mxu0 %v1506_v2  ;;  %v485_v7 = vld [vmem:[%s2122_s22 + $0x18] sm:$0xff]  ;;  %v1514_v8 = vld [vmem:[#allocation5 + $0x40] ss:$0 sps:$4 sm:$0x33]   ;;  %v1515_v10 = vld [vmem:[#allocation7] sm:$0xff]   ;;  %1336 = vmatprep.mubr.msk.bf16.mxu1 %vm1809_vm2, %v1808_v1  ;;  %s2285_s1 = sld [smem:[#allocation20_spill]] }
  0xc1   : > { %573 = vmatprep.subr.bf16.mxu0 %v1807_v0  ;;  %v487_v9 = vpack.c.bf16 %v485_v7, %v483_v5  ;;  %1321 = vmatpush3.bf16.msra.mxu1 %v1515_v10  ;;  %v1516_v11 = vld [vmem:[#allocation7 + $0x8] sm:$0xff]   ;;  %v1510_v12 = vld [vmem:[#allocation5 + $0x20] sm:$0xff]   ;;  %v569_v14 = vsel %vm567_vm1, %v1514_v8, 0  ;;  %v1517_v15 = vld [vmem:[#allocation7 + $0x10] sm:$0xff]   ;;  %s1228_s21 = sshll.u32 %s2118_s25, 4  ;;  %s1283_s26 = sshll.u32 %s1894_s23, 8 }
  0xc2   : > { %1322 = vmatprep.subr.bf16.mxu1 %v1808_v1  ;;  %v1511_v13 = vld [vmem:[#allocation5 + $0x28] sm:$0xff]   ;;  %v1518_v16 = vld [vmem:[#allocation7 + $0x18] sm:$0xff]   ;;  %v1512_v17 = vld [vmem:[#allocation5 + $0x30] sm:$0xff]   ;;  %s478_s24 = scalar_lea.vmem [#allocation13], %s1228_s21  ;;  %s2287_s27 = sld [smem:[#allocation22_spill]] }
  0xc3   : > { %1239 = vmatprep.mubr.msk.bf16.mxu0 %vm563_vm0, %v487_v9  ;;  %v1519_v18 = vld [vmem:[#allocation7 + $0x20] sm:$0xff]   ;;  %v1513_v19 = vld [vmem:[#allocation5 + $0x38] sm:$0xff]   ;;  %v1520_v20 = vld [vmem:[#allocation7 + $0x28] sm:$0xff]   ;;  %s1088_s13 = sshll.u32 %s478_s24, 4  ;;  %s1075_s15 = scalar_lea.sflag [#allocation4], %s2118_s25  ;;  %s2201_s13 = int_to_ptr.vmem [resolvable:$true] %s1088_s13 }
  0xc4   : > { %574 = vmatpush1.bf16.msra.mxu0 %v1507_v3  ;;  %v482_v21 = vld [vmem:[%s2122_s22] sm:$0xff]  ;;  %v484_v22 = vld [vmem:[%s2122_s22 + $0x10] sm:$0xff]  ;;  %s2286_s22 = sld [smem:[#allocation21_spill]]  ;;  %s1717_s23 = scalar_lea.vmem %s2201_s13, 256 }
  0xc5   : > { %575 = vmatprep.subr.bf16.mxu0 %v1807_v0  ;;  %1323 = vmatpush3.bf16.msra.mxu1 %v1516_v11  ;;  %v486_v23 = vpack.c.bf16 %v484_v22, %v482_v21  ;;  %v1521_v24 = vld [vmem:[#allocation7 + $0x30] sm:$0xff]   ;;  %v1522_v25 = vld [vmem:[#allocation7 + $0x38] sm:$0xff]   ;;  %v1523_v35 = vld [vmem:[#allocation8] sm:$0xff]   ;;  %p1718_p6 = scmp.ne.s32.totalorder %s2201_s13, %s1717_s23  ;;  %p2288_p9 = scmp.ne.s32.totalorder %s2275_s30, 0 }
  0xc6   : > { %1324 = vmatprep.subr.bf16.mxu1 %v1808_v1  ;;  %v1229_v26 = vld [vmem:[%s2251_s2] ss:$0 sm:$0xff]  ;;  %v1524_v37 = vld [vmem:[#allocation8 + $0x8] sm:$0xff]   ;;  %v1525_v38 = vld [vmem:[#allocation8 + $0x10] sm:$0xff]  }
  0xc7   : > { %v1526_v39 = vld [vmem:[#allocation8 + $0x18] sm:$0xff]   ;;  %v1527_v40 = vld [vmem:[#allocation8 + $0x20] sm:$0xff]   ;;  %v1528_v41 = vld [vmem:[#allocation8 + $0x28] sm:$0xff]   ;;  %p1719_p12 = pnand %p1718_p6, %p2288_p9 }
  0xc8   : > { %576 = vmatpush1.bf16.msra.mxu0 %v1508_v4  ;;  %v1529_v42 = vld [vmem:[#allocation8 + $0x30] sm:$0xff]   ;;  %v1530_v43 = vld [vmem:[#allocation8 + $0x38] sm:$0xff]   ;;  %v1531_v44 = vld [vmem:[#allocation10] sm:$0xff]   ;;  %s2206_s8 = scalar_lea.hbm %s2287_s27, %s1283_s26 }
  0xc9   : > { %577 = vmatprep.subr.bf16.mxu0 %v1807_v0  ;;  %1325 = vmatpush3.bf16.msra.mxu1 %v1517_v15  ;;  %v1532_v45 = vld [vmem:[#allocation10 + $0x8] sm:$0xff]   ;;  %v1533_v46 = vld [vmem:[#allocation10 + $0x10] sm:$0xff]   ;;  %v1534_v47 = vld [vmem:[#allocation10 + $0x18] sm:$0xff]   ;;  %p1720_p1 = pneg %p1719_p12 }
  0xca   : > { %1326 = vmatprep.subr.bf16.mxu1 %v1808_v1  ;;  %v1535_v48 = vld [vmem:[#allocation10 + $0x20] sm:$0xff]   ;;  %v1536_v49 = vld [vmem:[#allocation10 + $0x28] sm:$0xff]   ;;  %v1240_v50 = vld [vmem:[%s2253_s4] ss:$0 sm:$0xff] }
  0xcb   : > { %v1537_v60 = vld [vmem:[#allocation10 + $0x30] sm:$0xff]   ;;  %v1538_v61 = vld [vmem:[#allocation10 + $0x38] sm:$0xff]   ;;  %v1539_v62 = vld [vmem:[#allocation11] sm:$0xff]  }
  0xcc   : > { %578 = vmatpush1.bf16.msra.mxu0 %v1509_v6  ;;  %v1540_v63 = vld [vmem:[#allocation11 + $0x8] sm:$0xff]   ;;  %v1542_v2 = vld [vmem:[#allocation11 + $0x18] sm:$0xff]   ;;  %v1543_v3 = vld [vmem:[#allocation11 + $0x20] sm:$0xff]  }
  0xcd   : > { %579 = vmatprep.subr.bf16.mxu0 %v1807_v0  ;;  %1327 = vmatpush3.bf16.msra.mxu1 %v1518_v16  ;;  %v1544_v4 = vld [vmem:[#allocation11 + $0x28] sm:$0xff]   ;;  %v1249_v5 = vld [vmem:[%s2255_s6] ss:$0 sm:$0xff]  ;;  %v1545_v15 = vld [vmem:[#allocation11 + $0x30] sm:$0xff]  }
  0xce   : > { %1328 = vmatprep.subr.bf16.mxu1 %v1808_v1  ;;  %v1546_v16 = vld [vmem:[#allocation11 + $0x38] sm:$0xff]  }
  0xd0   : > { %580 = vmatpush1.bf16.msra.mxu0 %v1510_v12 }
  0xd1   : > { %581 = vmatprep.subr.bf16.mxu0 %v1807_v0  ;;  %1329 = vmatpush3.bf16.msra.mxu1 %v1519_v18 }
  0xd2   : > { %1330 = vmatprep.subr.bf16.mxu1 %v1808_v1 }
  0xd4   : > { %582 = vmatpush1.bf16.msra.mxu0 %v1511_v13 }
  0xd5   : > { %583 = vmatprep.subr.bf16.mxu0 %v1807_v0  ;;  %1331 = vmatpush3.bf16.msra.mxu1 %v1520_v20 }
  0xd6   : > { %1332 = vmatprep.subr.bf16.mxu1 %v1808_v1 }
  0xd8   : > { %584 = vmatpush1.bf16.msra.mxu0 %v1512_v17  ;;  %v1258_v17 = vld [vmem:[%s2285_s1] ss:$0 sm:$0xff]  ;;  %s1810_s1 = smov [#allocation13]  }
  0xd9   : > { %585 = vmatprep.subr.bf16.mxu0 %v1807_v0  ;;  %1333 = vmatpush3.bf16.msra.mxu1 %v1521_v24  ;;  %s1721_s21 = sshll.u32 %s1810_s1, 4  ;;  %s1722_s21 = int_to_ptr.vmem [resolvable:$false] %s1721_s21 }
  0xda   : > { %1334 = vmatprep.subr.bf16.mxu1 %v1808_v1  ;;  %s1723_s28 = scalar_lea.vmem %s1722_s21, 512  ;;  %p1724_p13 = scmp.lt.s32.totalorder %s2201_s13, %s1722_s21 }
  0xdb   : > { %p1725_p0 = scmp.lt.s32.totalorder %s1723_s28, %s1717_s23 }
  0xdc   : > { %586 = vmatpush1.bf16.msra.mxu0 %v1513_v19 }
  0xdd   : > { %587 = vmatprep.subr.bf16.mxu0 %v1807_v0  ;;  %1335 = vmatpush3.bf16.msra.mxu1 %v1522_v25  ;;  %v1541_v0 = vld [vmem:[#allocation11 + $0x10] sm:$0xff]   ;;  %p1726_p2 = por %p1725_p0, %p1724_p13 }
  0xde   : > { %1340 = vmatprep.subr.bf16.mxu1 %v1808_v1 }
  0xdf   : > { %p1727_p7 = pnand %p1726_p2, %p1720_p1 }
  0xe0   : > { %588 = vmatpush1.bf16.msra.mxu0 %v569_v14 }
  0xe1   : > { %1360 = vmatprep.subr.bf16.mxu0 %v1808_v1 }
  0xe3   : > { %604 = vmatmul.mubr.bf16.vlgmr.msra.gmra.mrb[0].mxu0 %v486_v23 }
  0xe4   : > { %1376 = vmatprep.mubr.msk.bf16.mxu0 %vm1809_vm2, %v1808_v1  ;;  %1361 = vmatpush3.bf16.msra.mxu0 %v1531_v44 }
  0xe5   : > { %1362 = vmatprep.subr.bf16.mxu0 %v1808_v1 }
  0xe8   : > { %1363 = vmatpush3.bf16.msra.mxu0 %v1532_v45 }
  0xe9   : > { %1364 = vmatprep.subr.bf16.mxu0 %v1808_v1 }
  0xec   : > { %1365 = vmatpush3.bf16.msra.mxu0 %v1533_v46 }
  0xed   : > { %1366 = vmatprep.subr.bf16.mxu0 %v1808_v1 }
  0xf0   : > { %1367 = vmatpush3.bf16.msra.mxu0 %v1534_v47 }
  0xf1   : > { %1368 = vmatprep.subr.bf16.mxu0 %v1808_v1 }
  0xf4   : > { %1369 = vmatpush3.bf16.msra.mxu0 %v1535_v48 }
  0xf5   : > { %1370 = vmatprep.subr.bf16.mxu0 %v1808_v1 }
  0xf8   : > { %1371 = vmatpush3.bf16.msra.mxu0 %v1536_v49 }
  0xf9   : > { %1372 = vmatprep.subr.bf16.mxu0 %v1808_v1 }
  0xfc   : > { %1373 = vmatpush3.bf16.msra.mxu0 %v1537_v60 }
  0xfd   : > { %1374 = vmatprep.subr.bf16.mxu0 %v1808_v1 }
 0x100   : > { %1375 = vmatpush3.bf16.msra.mxu0 %v1538_v61 }
 0x1b6   : > { %v605_v27 = vpop.f32.mrb[0].mxu0 }
 0x1b7   : > { %v606_v28 = vadd.f32 %v1229_v26, %v605_v27  ;;  %v607_v29 = vpop.f32.mrb[1].mxu0 }
 0x1b8   : > { %v608_v30 = vpop.f32.mrb[2].mxu0 }
 0x1b9   : > { %v609_v31 = vadd.f32 %v1229_v26, %v608_v30  ;;  %v610_v32 = vpop.f32.mrb[3].mxu0  ;;  %v612_v33 = vmax.f32 %v606_v28, 0.0 }
 0x1bb   : > { %v613_v34 = vmax.f32 %v609_v31, 0.0 }
 0x1bd   : > { %v614_v36 = vpack.c.bf16 %v613_v34, %v612_v33 }
 0x1bf   : > { %1337 = vmatmul.mubr.bf16.vlgmr.msra.gmra.mrb[0].mxu1 %v614_v36 }
 0x1c0   : > { %1341 = vmatpush3.bf16.msra.mxu1 %v1523_v35  ;;  %1356 = vmatprep.mubr.msk.bf16.mxu1 %vm1809_vm2, %v1808_v1 }
 0x1c1   : > { %1342 = vmatprep.subr.bf16.mxu1 %v1808_v1 }
 0x1c4   : > { %1343 = vmatpush3.bf16.msra.mxu1 %v1524_v37 }
 0x1c5   : > { %1344 = vmatprep.subr.bf16.mxu1 %v1808_v1 }
 0x1c8   : > { %1345 = vmatpush3.bf16.msra.mxu1 %v1525_v38 }
 0x1c9   : > { %1346 = vmatprep.subr.bf16.mxu1 %v1808_v1 }
 0x1cc   : > { %1347 = vmatpush3.bf16.msra.mxu1 %v1526_v39 }
 0x1cd   : > { %1348 = vmatprep.subr.bf16.mxu1 %v1808_v1 }
 0x1d0   : > { %1349 = vmatpush3.bf16.msra.mxu1 %v1527_v40 }
 0x1d1   : > { %1350 = vmatprep.subr.bf16.mxu1 %v1808_v1 }
 0x1d4   : > { %1351 = vmatpush3.bf16.msra.mxu1 %v1528_v41 }
 0x1d5   : > { %1352 = vmatprep.subr.bf16.mxu1 %v1808_v1 }
 0x1d8   : > { %1353 = vmatpush3.bf16.msra.mxu1 %v1529_v42 }
 0x1d9   : > { %1354 = vmatprep.subr.bf16.mxu1 %v1808_v1 }
 0x1dc   : > { %1355 = vmatpush3.bf16.msra.mxu1 %v1530_v43 }
 0x1dd   : > { %1380 = vmatprep.subr.bf16.mxu1 %v1808_v1 }
 0x292   : > { %v720_v51 = vpop.f32.mrb[0].mxu1 }
 0x293   : > { %v721_v52 = vadd.f32 %v1240_v50, %v720_v51  ;;  %v1338_v53 = vpop.f32.mrb[1].mxu1 }
 0x294   : > { %v723_v54 = vpop.f32.mrb[2].mxu1 }
 0x295   : > { %v724_v55 = vadd.f32 %v1240_v50, %v723_v54  ;;  %v1339_v56 = vpop.f32.mrb[3].mxu1  ;;  %v727_v57 = vmax.f32 %v721_v52, 0.0 }
 0x297   : > { %v728_v58 = vmax.f32 %v724_v55, 0.0 }
 0x299   : > { %v729_v59 = vpack.c.bf16 %v728_v58, %v727_v57 }
 0x29b   : > { %1357 = vmatmul.mubr.bf16.vlgmr.msra.gmra.mrb[4].mxu1 %v729_v59 }
 0x29c   : > { %1396 = vmatprep.mubr.msk.bf16.mxu1 %vm1809_vm2, %v1808_v1  ;;  %1381 = vmatpush3.bf16.msra.mxu1 %v1539_v62 }
 0x29d   : > { %1382 = vmatprep.subr.bf16.mxu1 %v1808_v1 }
 0x2a0   : > { %1383 = vmatpush3.bf16.msra.mxu1 %v1540_v63 }
 0x2a1   : > { %1384 = vmatprep.subr.bf16.mxu1 %v1808_v1 }
 0x2a4   : > { %1385 = vmatpush3.bf16.msra.mxu1 %v1541_v0 }
 0x2a5   : > { %1386 = vmatprep.subr.bf16.mxu1 %v1808_v1 }
 0x2a8   : > { %1387 = vmatpush3.bf16.msra.mxu1 %v1542_v2 }
 0x2a9   : > { %1388 = vmatprep.subr.bf16.mxu1 %v1808_v1 }
 0x2ac   : > { %1389 = vmatpush3.bf16.msra.mxu1 %v1543_v3 }
 0x2ad   : > { %1390 = vmatprep.subr.bf16.mxu1 %v1808_v1 }
 0x2b0   : > { %1391 = vmatpush3.bf16.msra.mxu1 %v1544_v4 }
 0x2b1   : > { %1392 = vmatprep.subr.bf16.mxu1 %v1808_v1 }
 0x2b4   : > { %1393 = vmatpush3.bf16.msra.mxu1 %v1545_v15 }
 0x2b5   : > { %1394 = vmatprep.subr.bf16.mxu1 %v1808_v1  ;;  %v1267_v1 = vld [vmem:[%s2286_s22] ss:$0 sm:$0xff] }
 0x2b8   : > { %1395 = vmatpush3.bf16.msra.mxu1 %v1546_v16 }
 0x36e   : > { %v835_v6 = vpop.f32.mrb[4].mxu1 }
 0x36f   : > { %v836_v7 = vadd.f32 %v1249_v5, %v835_v6  ;;  %v1358_v8 = vpop.f32.mrb[5].mxu1 }
 0x370   : > { %v838_v9 = vpop.f32.mrb[6].mxu1 }
 0x371   : > { %v839_v10 = vadd.f32 %v1249_v5, %v838_v9  ;;  %v1359_v11 = vpop.f32.mrb[7].mxu1  ;;  %v842_v12 = vmax.f32 %v836_v7, 0.0 }
 0x373   : > { %v843_v13 = vmax.f32 %v839_v10, 0.0 }
 0x375   : > { %v844_v14 = vpack.c.bf16 %v843_v13, %v842_v12 }
 0x377   : > { %1377 = vmatmul.mubr.bf16.vlgmr.msra.gmra.mrb[4].mxu0 %v844_v14 }
 0x44a   : > { %v950_v18 = vpop.f32.mrb[4].mxu0 }
 0x44b   : > { %v951_v19 = vadd.f32 %v1258_v17, %v950_v18  ;;  %v1378_v20 = vpop.f32.mrb[5].mxu0 }
 0x44c   : > { %v953_v21 = vpop.f32.mrb[6].mxu0 }
 0x44d   : > { %v954_v22 = vadd.f32 %v1258_v17, %v953_v21  ;;  %v1379_v23 = vpop.f32.mrb[7].mxu0  ;;  %v957_v24 = vmax.f32 %v951_v19, 0.0 }
 0x44f   : > { %v958_v25 = vmax.f32 %v954_v22, 0.0 }
 0x451   : > { %v959_v26 = vpack.c.bf16 %v958_v25, %v957_v24 }
 0x453   : > { %1397 = vmatmul.mubr.bf16.vlgmr.msra.gmra.mrb[8].mxu1 %v959_v26 }
 0x526   : > { %v1065_v27 = vpop.f32.mrb[8].mxu1 }
 0x527   : > { %v1066_v28 = vadd.f32 %v1267_v1, %v1065_v27  ;;  %v1398_v29 = vpop.f32.mrb[9].mxu1 }
 0x528   : > { %v1068_v30 = vpop.f32.mrb[10].mxu1 }
 0x529   : > { %1072 = vst [vmem:[%s478_s24] sm:$0xff] %v1066_v28  ;;  %v1069_v31 = vadd.f32 %v1267_v1, %v1068_v30  ;;  %v1399_v32 = vpop.f32.mrb[11].mxu1 }
 0x52b   : > { %1073 = vst [vmem:[%s478_s24 + $0x8] sm:$0xff] %v1069_v31 }
 0x52c   : > { %1730 = shalt.err (!%p1727_p7)
}
 0x52d   : > { %s1731_s12 = scalar_lea.hbm %s2206_s8, 256  ;;  %s1735_s26 = scalar_lea.hbm %s2287_s27, 1024 }
 0x52e   : > { %p1732_p5 = scmp.ne.s32.totalorder %s2206_s8, %s1731_s12  ;;  %p1736_p3 = scmp.lt.u32.totalorder %s2206_s8, %s2287_s27 }
 0x52f   : > { %p1737_p4 = scmp.lt.u32.totalorder %s1735_s26, %s1731_s12  ;;  %p1739_p6 = scmp.lt.u32.totalorder %s1731_s12, %s2206_s8 }
 0x530   : > { %p1733_p10 = pnand %p1732_p5, %p2288_p9 }
 0x531   : > { %p1738_p8 = por %p1737_p4, %p1736_p3 }
 0x532   : > { %p1734_p11 = pneg %p1733_p10 }
 0x533   : > { %p1740_p12 = por %p1739_p6, %p1738_p8 }
 0x535   : > { %p1741_p1 = pnand %p1740_p12, %p1734_p11 }
 0x537   : > { %1744 = shalt.err (!%p1741_p1)
}
 0x538   : > { %s1811_s23 = smov 128   ;;  %s1812_s1 = smov 8  }
 0x539   : > { %1422 = dma.vmem_to_hbm [thread:$0]  (%p2288_p9), %s2201_s13, 256, %s2206_s8, %s1075_s15, %s1811_s23, %s1811_s23, %s1812_s1  }
 0x53a PF: > { %p1459_p13 = scmp.ge.s32.totalorder %s1795_s20, 2  ;;  %s1103_s21 = sand.u32 1, %s1783_s17  }
 0x53b   : > { %p2289_p0 = scmp.ne.s32.totalorder %s2276_s14, 0  ;;  %s1104_s28 = scalar_lea.sflag [#allocation4], %s1103_s21 }
 0x53d   : > { %p1445_p2 = pnand %p1459_p13, %p2289_p0 }
 0x53f   : > { %1778 = dma.done.wait (!%p1445_p2), %s1104_s28, 256  }
 0x540   : > { %1780 = vsyncadd (!%p1445_p2), %s1104_s28, 4294967040  ;;  %p27_p7 = scmp.ge.s32.totalorder %s2045_s16, 6   ;;  %s2290_s17 = smov %s1787_s18 }
 0x541   : > { %s2291_s18 = smov %s1791_s19  ;;  %s2292_s19 = smov %s2057_s10 }
 0x542   : > { %s2293_s20 = smov %s2045_s16  ;;  %29 = sbr.rel (!%p27_p7) target bundleno = 13 (0xd), region = 129 }
 0x549   :  { %1109 = vsyncpa [#allocation3], 1 }
 0x54a   :  { %1111 = vsyncpa [#allocation3 + $0x1], 1 }
 0x54b   :  { %1112 = vsyncpa [#allocation6], 1 }
 0x54c   :  { %1113 = vsyncpa [#allocation9], 1 }
 0x54d   :  { %1114 = vsyncpa [#allocation12], 1 }
 0x54e   :  { %1115 = vsyncpa [#allocation4], 1 }
 0x54f   :  { %1117 = vsyncpa [#allocation4 + $0x1], 1 }

</bundles_post_ra>
